<compile_context>
chip_gen: v7x
topology: tpu7x:2x2x1
jax: 0.10.0
libtpu: 0.0.40
codegen_flags: <defaults>
</compile_context>

<pallas_src>
import math

import jax
import jax.numpy as jnp
from jax.experimental import pallas as pl
from jax.experimental.pallas import tpu as pltpu


def _round_up(x, m):
    return ((x + m - 1) // m) * m


def _noisy_linear_kernel(x_ref, wmu_ref, wsig_ref, eps_in_ref, eps_out_ref,
                         bias_ref, o_ref, acc_ref):
    """One (tB, tO) output tile, accumulated over the K (input_dim) grid axis.

    x_ref      : (tB, tI)  activations
    wmu_ref    : (tI, tO)  weight_mu,    pre-transposed to [I, O]
    wsig_ref   : (tI, tO)  weight_sigma, pre-transposed to [I, O]
    eps_in_ref : (tI, 1)   factorized noise (input side)
    eps_out_ref: (1, tO)   factorized noise (output side)
    bias_ref   : (1, tO)   pre-combined bias (mu + sigma * eps)
    o_ref      : (tB, tO)  output tile
    acc_ref    : (tB, tO)  f32 VMEM accumulator scratch
    """
    k = pl.program_id(2)

    @pl.when(k == 0)
    def _init():
        acc_ref[...] = jnp.zeros_like(acc_ref)

    # Rebuild the factorized weight-noise tile on the [I, O] layout (VPU only,
    # no XLU transpose): eps[i, o] = eps_in[i] * eps_out[o].
    eps_tile = eps_in_ref[...] * eps_out_ref[...]        # (tI,1)*(1,tO) -> (tI,tO)
    w = wmu_ref[...] + wsig_ref[...] * eps_tile          # perturbed weight tile

    # F.linear(x, W, b) == x @ W.T + b ; W.T is exactly the [I, O] layout here.
    acc_ref[...] += jnp.dot(x_ref[...], w, preferred_element_type=jnp.float32)

    @pl.when(k == pl.num_programs(2) - 1)
    def _finalize():
        o_ref[...] = (acc_ref[...] + bias_ref[...]).astype(o_ref.dtype)


def noisy_linear_forward(x, params, training=True, *, tb=128, to=512, ti=512):
    """Forward pass of the NoisyNet linear layer.

    params:
      weight_mu    [O, I]   weight_sigma [O, I]
      eps_in       [I]      eps_out      [O]      (factorized weight_epsilon)
      bias_mu      [O]      bias_sigma   [O]      bias_epsilon [O]
    """
    if not training:
        # Plain dense matmul: XLA already pipelines this optimally; no Pallas.
        return x @ params["weight_mu"].T + params["bias_mu"]

    B, I = x.shape
    O = params["weight_mu"].shape[0]

    # Tiny vector combine -> wrapper (removes two padded [1,O] HBM streams).
    bias = params["bias_mu"] + params["bias_sigma"] * params["bias_epsilon"]

    # One-time layout plumbing: [O, I] -> [I, O] so the kernel never transposes.
    wmu_t = jnp.transpose(params["weight_mu"])
    wsig_t = jnp.transpose(params["weight_sigma"])

    # Tile sizes, clamped for small problems; keep last block dims lane-dense
    # (multiples of 128) and sublane dims multiples of 8.
    tb = min(tb, _round_up(B, 8))
    to = min(to, _round_up(O, 128))
    ti = min(ti, _round_up(I, 128))
    Bp, Op, Ip = _round_up(B, tb), _round_up(O, to), _round_up(I, ti)

    f32 = jnp.float32
    x_p = jnp.pad(x.astype(f32), ((0, Bp - B), (0, Ip - I)))
    wmu_p = jnp.pad(wmu_t.astype(f32), ((0, Ip - I), (0, Op - O)))
    wsig_p = jnp.pad(wsig_t.astype(f32), ((0, Ip - I), (0, Op - O)))
    eps_in_p = jnp.pad(params["eps_in"].astype(f32), (0, Ip - I)).reshape(Ip, 1)
    eps_out_p = jnp.pad(params["eps_out"].astype(f32), (0, Op - O)).reshape(1, Op)
    bias_p = jnp.pad(bias.astype(f32), (0, Op - O)).reshape(1, Op)

    grid = (Bp // tb, Op // to, Ip // ti)

    # Advisory cost hint for the XLA scheduler around the custom call.
    bytes_accessed = 4 * (Bp * Ip + 2 * Ip * Op + Bp * Op + Ip + 3 * Op)
    cost = pl.CostEstimate(flops=2 * Bp * Ip * Op + 3 * Ip * Op,
                           transcendentals=0,
                           bytes_accessed=bytes_accessed)

    out_p = pl.pallas_call(
        _noisy_linear_kernel,
        out_shape=jax.ShapeDtypeStruct((Bp, Op), f32),
        grid_spec=pltpu.PrefetchScalarGridSpec(
            num_scalar_prefetch=0,
            grid=grid,
            in_specs=[
                pl.BlockSpec((tb, ti), lambda b, o, k: (b, k)),   # x
                pl.BlockSpec((ti, to), lambda b, o, k: (k, o)),   # weight_mu^T
                pl.BlockSpec((ti, to), lambda b, o, k: (k, o)),   # weight_sigma^T
                pl.BlockSpec((ti, 1), lambda b, o, k: (k, 0)),    # eps_in column
                pl.BlockSpec((1, to), lambda b, o, k: (0, o)),    # eps_out row
                pl.BlockSpec((1, to), lambda b, o, k: (0, o)),    # combined bias
            ],
            out_specs=pl.BlockSpec((tb, to), lambda b, o, k: (b, o)),
            scratch_shapes=[pltpu.VMEM((tb, to), jnp.float32)],
        ),
        compiler_params=pltpu.CompilerParams(
            dimension_semantics=("parallel", "parallel", "arbitrary"),
            vmem_limit_bytes=48 * 1024 * 1024,  # fits v7x's 64 MiB VMEM too
        ),
        cost_estimate=cost,
    )(x_p, wmu_p, wsig_p, eps_in_p, eps_out_p, bias_p)

    return out_p[:B, :O]


def _scale_noise(key, size):
    # x = randn(size); x.sign() * sqrt(|x|)   (matches NoisyNet _scale_noise)
    x = jax.random.normal(key, (size,), dtype=jnp.float32)
    return jnp.sign(x) * jnp.sqrt(jnp.abs(x))


def init_noisy_linear(key, input_dim, output_dim, std_init=0.4):
    """Deterministic re-implementation of reset_parameters() + reset_noise().

    weight_epsilon is kept in its factorized form (eps_out, eps_in); the kernel
    reconstructs outer(eps_out, eps_in) per tile on the fly.
    """
    k_wmu, k_bmu, k_ein, k_eout, k_beps = jax.random.split(key, 5)
    mu_range = 1.0 / math.sqrt(input_dim)

    weight_mu = jax.random.uniform(
        k_wmu, (output_dim, input_dim), jnp.float32, -mu_range, mu_range)
    weight_sigma = jnp.full((output_dim, input_dim),
                            std_init / math.sqrt(input_dim), jnp.float32)
    bias_mu = jax.random.uniform(
        k_bmu, (output_dim,), jnp.float32, -mu_range, mu_range)
    bias_sigma = jnp.full((output_dim,),
                          std_init / math.sqrt(output_dim), jnp.float32)

    eps_in = _scale_noise(k_ein, input_dim)      # post sign*sqrt transform
    eps_out = _scale_noise(k_eout, output_dim)   # post sign*sqrt transform
    bias_epsilon = _scale_noise(k_beps, output_dim)

    return {
        "weight_mu": weight_mu,
        "weight_sigma": weight_sigma,
        "eps_in": eps_in,
        "eps_out": eps_out,
        "bias_mu": bias_mu,
        "bias_sigma": bias_sigma,
        "bias_epsilon": bias_epsilon,
    }


def _reference_forward(x, params, training=True):
    if training:
        weight_epsilon = jnp.outer(params["eps_out"], params["eps_in"])
        w = params["weight_mu"] + params["weight_sigma"] * weight_epsilon
        b = params["bias_mu"] + params["bias_sigma"] * params["bias_epsilon"]
    else:
        w, b = params["weight_mu"], params["bias_mu"]
    return x @ w.T + b


if __name__ == "__main__":
    key = jax.random.PRNGKey(0)
    k_init, k_x, k_init2, k_x2 = jax.random.split(key, 4)

    # --- Small demo shapes (single grid step, exercises padding paths). ---
    batch, input_dim, output_dim = 8, 32, 16
    params = init_noisy_linear(k_init, input_dim, output_dim, std_init=0.4)
    x = jax.random.normal(k_x, (batch, input_dim), dtype=jnp.float32)

    out = noisy_linear_forward(x, params, training=True)
    out = jax.block_until_ready(out)
    assert out.shape == (batch, output_dim)
    ref = _reference_forward(x, params, training=True)
    assert jnp.allclose(out, ref, atol=1e-4, rtol=1e-4), "training mismatch vs reference"

    # Eval-mode forward (mu only) -> plain XLA matmul path.
    out_eval = noisy_linear_forward(x, params, training=False)
    out_eval = jax.block_until_ready(out_eval)
    ref_eval = _reference_forward(x, params, training=False)
    assert jnp.allclose(out_eval, ref_eval, atol=1e-4, rtol=1e-4), "eval mismatch"

    # --- Multi-tile check: forces a real (2, 2, 3) grid so the K-axis
    #     accumulator init/accumulate/finalize path is exercised on-device. ---
    batch2, input_dim2, output_dim2 = 16, 384, 192
    params2 = init_noisy_linear(k_init2, input_dim2, output_dim2, std_init=0.4)
    x2 = jax.random.normal(k_x2, (batch2, input_dim2), dtype=jnp.float32)

    out2 = noisy_linear_forward(x2, params2, training=True, tb=8, to=128, ti=128)
    out2 = jax.block_until_ready(out2)
    ref2 = _reference_forward(x2, params2, training=True)
    assert jnp.allclose(out2, ref2, atol=1e-4, rtol=1e-4), "multi-tile training mismatch"

    print("KERNEL_OK")
</pallas_src>

<mosaic_0001>
module attributes {stable_mosaic.version = 11 : i64} {
  func.func @_noisy_linear_kernel(%arg0: i32, %arg1: i32, %arg2: i32, %arg3: memref<8x128xf32, #tpu.memory_space<vmem>>, %arg4: memref<128x128xf32, #tpu.memory_space<vmem>>, %arg5: memref<128x128xf32, #tpu.memory_space<vmem>>, %arg6: memref<128x1xf32, #tpu.memory_space<vmem>>, %arg7: memref<1x128xf32, #tpu.memory_space<vmem>>, %arg8: memref<1x128xf32, #tpu.memory_space<vmem>>, %arg9: memref<8x128xf32, #tpu.memory_space<vmem>>, %arg10: memref<8x128xf32, #tpu.memory_space<vmem>>) attributes {dimension_semantics = [#tpu.dimension_semantics<parallel>, #tpu.dimension_semantics<parallel>, #tpu.dimension_semantics<arbitrary>], iteration_bounds = array<i64: 1, 1, 1>, scalar_prefetch = 0 : i64, scratch_operands = 1 : i64, tpu.core_type = #tpu.core_type<tc>, window_params = [{transform_indices = @transform_0, window_bounds = array<i64: 8, 128>}, {transform_indices = @transform_1, window_bounds = array<i64: 128, 128>}, {transform_indices = @transform_2, window_bounds = array<i64: 128, 128>}, {transform_indices = @transform_3, window_bounds = array<i64: 128, 1>}, {transform_indices = @transform_4, window_bounds = array<i64: 1, 128>}, {transform_indices = @transform_5, window_bounds = array<i64: 1, 128>}, {transform_indices = @transform_6, window_bounds = array<i64: 8, 128>}]} {
    %c0_i32 = arith.constant 0 : i32
    %0 = arith.cmpi eq, %arg2, %c0_i32 : i32
    %1 = arith.extui %0 : i1 to i32
    %c0_i32_0 = arith.constant 0 : i32
    %2 = arith.cmpi ne, %1, %c0_i32_0 : i32
    scf.if %2 {
      %cst_16 = arith.constant 0.000000e+00 : f32
      %20 = vector.broadcast %cst_16 : f32 to vector<8x128xf32>
      %c0_17 = arith.constant 0 : index
      %c0_18 = arith.constant 0 : index
      %21 = vector.load %arg10[%c0_17, %c0_18] : memref<8x128xf32, #tpu.memory_space<vmem>>, vector<8x128xf32>
      tpu.vector_store %arg10[%c0_17, %c0_18], %20 {strides = array<i32>} : memref<8x128xf32, #tpu.memory_space<vmem>>, vector<8x128xf32>,
    } else {
    }
    %c0 = arith.constant 0 : index
    %c0_1 = arith.constant 0 : index
    %3 = vector.load %arg6[%c0, %c0_1] : memref<128x1xf32, #tpu.memory_space<vmem>>, vector<128x1xf32>
    %c0_2 = arith.constant 0 : index
    %c0_3 = arith.constant 0 : index
    %4 = vector.load %arg7[%c0_2, %c0_3] : memref<1x128xf32, #tpu.memory_space<vmem>>, vector<1x128xf32>
    %5 = vector.broadcast %3 : vector<128x1xf32> to vector<128x128xf32>
    %6 = vector.broadcast %4 : vector<1x128xf32> to vector<128x128xf32>
    %7 = arith.mulf %5, %6 : vector<128x128xf32>
    %c0_4 = arith.constant 0 : index
    %c0_5 = arith.constant 0 : index
    %8 = vector.load %arg4[%c0_4, %c0_5] : memref<128x128xf32, #tpu.memory_space<vmem>>, vector<128x128xf32>
    %c0_6 = arith.constant 0 : index
    %c0_7 = arith.constant 0 : index
    %9 = vector.load %arg5[%c0_6, %c0_7] : memref<128x128xf32, #tpu.memory_space<vmem>>, vector<128x128xf32>
    %10 = arith.mulf %9, %7 : vector<128x128xf32>
    %11 = arith.addf %8, %10 : vector<128x128xf32>
    %c0_8 = arith.constant 0 : index
    %c0_9 = arith.constant 0 : index
    %12 = vector.load %arg10[%c0_8, %c0_9] : memref<8x128xf32, #tpu.memory_space<vmem>>, vector<8x128xf32>
    %c0_10 = arith.constant 0 : index
    %c0_11 = arith.constant 0 : index
    %13 = vector.load %arg3[%c0_10, %c0_11] : memref<8x128xf32, #tpu.memory_space<vmem>>, vector<8x128xf32>
    %cst = arith.constant dense<0.000000e+00> : vector<8x128xf32>
    %14 = tpu.matmul %13, %11, %cst {dimension_numbers = #tpu.dot_dimension_numbers<[1], [0], [0], [1], [0, 0, 1, 1], [], []>} : vector<8x128xf32>, vector<128x128xf32>, vector<8x128xf32> -> vector<8x128xf32>
    %15 = arith.addf %12, %14 : vector<8x128xf32>
    %c0_12 = arith.constant 0 : index
    %c0_13 = arith.constant 0 : index
    %16 = vector.load %arg10[%c0_12, %c0_13] : memref<8x128xf32, #tpu.memory_space<vmem>>, vector<8x128xf32>
    tpu.vector_store %arg10[%c0_12, %c0_13], %15 {strides = array<i32>} : memref<8x128xf32, #tpu.memory_space<vmem>>, vector<8x128xf32>,
    %c0_i32_14 = arith.constant 0 : i32
    %17 = arith.cmpi eq, %arg2, %c0_i32_14 : i32
    %18 = arith.extui %17 : i1 to i32
    %c0_i32_15 = arith.constant 0 : i32
    %19 = arith.cmpi ne, %18, %c0_i32_15 : i32
    scf.if %19 {
      %c0_16 = arith.constant 0 : index
      %c0_17 = arith.constant 0 : index
      %20 = vector.load %arg10[%c0_16, %c0_17] : memref<8x128xf32, #tpu.memory_space<vmem>>, vector<8x128xf32>
      %c0_18 = arith.constant 0 : index
      %c0_19 = arith.constant 0 : index
      %21 = vector.load %arg8[%c0_18, %c0_19] : memref<1x128xf32, #tpu.memory_space<vmem>>, vector<1x128xf32>
      %22 = vector.broadcast %21 : vector<1x128xf32> to vector<8x128xf32>
      %23 = arith.addf %20, %22 : vector<8x128xf32>
      %c0_20 = arith.constant 0 : index
      %c0_21 = arith.constant 0 : index
      %24 = vector.load %arg9[%c0_20, %c0_21] : memref<8x128xf32, #tpu.memory_space<vmem>>, vector<8x128xf32>
      tpu.vector_store %arg9[%c0_20, %c0_21], %23 {strides = array<i32>} : memref<8x128xf32, #tpu.memory_space<vmem>>, vector<8x128xf32>,
    } else {
    }
    return
  }
  func.func @transform_0(%arg0: i32, %arg1: i32, %arg2: i32) -> (i32, i32) {
    %c0_i32 = arith.constant 0 : i32
    return %arg0, %arg2 : i32, i32
  }
  func.func @transform_1(%arg0: i32, %arg1: i32, %arg2: i32) -> (i32, i32) {
    %c0_i32 = arith.constant 0 : i32
    return %arg2, %arg1 : i32, i32
  }
  func.func @transform_2(%arg0: i32, %arg1: i32, %arg2: i32) -> (i32, i32) {
    %c0_i32 = arith.constant 0 : i32
    return %arg2, %arg1 : i32, i32
  }
  func.func @transform_3(%arg0: i32, %arg1: i32, %arg2: i32) -> (i32, i32) {
    %c0_i32 = arith.constant 0 : i32
    %c0_i32_0 = arith.constant 0 : i32
    return %arg2, %c0_i32 : i32, i32
  }
  func.func @transform_4(%arg0: i32, %arg1: i32, %arg2: i32) -> (i32, i32) {
    %c0_i32 = arith.constant 0 : i32
    %c0_i32_0 = arith.constant 0 : i32
    return %c0_i32, %arg1 : i32, i32
  }
  func.func @transform_5(%arg0: i32, %arg1: i32, %arg2: i32) -> (i32, i32) {
    %c0_i32 = arith.constant 0 : i32
    %c0_i32_0 = arith.constant 0 : i32
    return %c0_i32, %arg1 : i32, i32
  }
  func.func @transform_6(%arg0: i32, %arg1: i32, %arg2: i32) -> (i32, i32) {
    %c0_i32 = arith.constant 0 : i32
    return %arg0, %arg1 : i32, i32
  }
}

</mosaic_0001>

<bundles_post_ra>
// kernel: tpu_custom_call.1
= control target key start
LH: loop header
LB: loop body
LE: loop exit
PB: predicated region body
PF: predicated region fallthrough
CT: control target
= control target key end

     0   :  { %11 = vsyncpa [#allocation4], 0  ;;  %s717_s0 = inlined_call_operand.hbm [shape: f32[8,128], index: 0, kind: input, shape index: {}]   ;;  %s718_s1 = inlined_call_operand.vmem [shape: f32[128,128], index: 1, kind: input, shape index: {}]   ;;  %s719_s2 = inlined_call_operand.hbm [shape: f32[128,128], index: 2, kind: input, shape index: {}]   ;;  %s720_s3 = inlined_call_operand.vmem [shape: f32[128,1], index: 3, kind: input, shape index: {}]   ;;  %s721_s4 = inlined_call_operand.vmem [shape: f32[1,128], index: 4, kind: input, shape index: {}]   ;;  %s722_s5 = inlined_call_operand.vmem [shape: f32[1,128], index: 5, kind: input, shape index: {}]   ;;  %s723_s6 = inlined_call_operand.hbm [shape: f32[8,128], index: 6, kind: output, shape index: {}]  }
   0x1   :  { %12 = vsyncpa [#allocation7], 0 }
   0x2   :  { %13 = vsyncpa [#allocation5], 0  ;;  %s502_s21 = smov [#allocation3]   ;;  %s503_s23 = smov [#allocation6]  }
   0x3   :  { %s20_s22 = sshll.u32 %s502_s21, 4  ;;  %s31_s24 = sshll.u32 %s503_s23, 4  ;;  %s21_s22 = int_to_ptr.vmem [resolvable:$true] %s20_s22  ;;  %s546_s24 = int_to_ptr.vmem [resolvable:$true] %s31_s24 }
   0x4   :  { %s430_s27 = scalar_lea.hbm %s717_s0, 128 }
   0x5   :  { %p431_p0 = scmp.ne.s32.totalorder %s717_s0, %s430_s27  ;;  %p434_p1 = scmp.lt.u32.totalorder %s430_s27, %s717_s0 }
   0x7   :  { %p436_p2 = pnand %p434_p1, %p431_p0 }
   0x9   :  { %439 = shalt.err (!%p436_p2)
}
   0xa   :  { %s440_s8 = scalar_lea.vmem %s21_s22, 128  ;;  %p445_p4 = scmp.lt.s32.totalorder %s21_s22, %s21_s22 }
   0xb   :  { %p441_p3 = scmp.ne.s32.totalorder %s21_s22, %s440_s8  ;;  %p446_p5 = scmp.lt.s32.totalorder %s440_s8, %s440_s8 }
   0xd   :  { %p447_p6 = por %p446_p5, %p445_p4 }
   0xf   :  { %p448_p7 = pnand %p447_p6, %p441_p3 }
  0x11   :  { %451 = shalt.err (!%p448_p7)
}
  0x12   :  { %23 = dma.hbm_to_vmem [thread:$0]  %s717_s0, 128, %s21_s22, [#allocation4]  }
  0x13   :  { %s452_s13 = scalar_lea.hbm %s719_s2, 2048 }
  0x14   :  { %p453_p8 = scmp.ne.s32.totalorder %s719_s2, %s452_s13  ;;  %p456_p9 = scmp.lt.u32.totalorder %s452_s13, %s719_s2 }
  0x16   :  { %p458_p10 = pnand %p456_p9, %p453_p8 }
  0x18   :  { %461 = shalt.err (!%p458_p10)
}
  0x19   :  { %s462_s18 = scalar_lea.vmem %s546_s24, 2048  ;;  %p467_p12 = scmp.lt.s32.totalorder %s546_s24, %s546_s24 }
  0x1a   :  { %p463_p11 = scmp.ne.s32.totalorder %s546_s24, %s462_s18  ;;  %p468_p13 = scmp.lt.s32.totalorder %s462_s18, %s462_s18 }
  0x1c   :  { %p469_p0 = por %p468_p13, %p467_p12 }
  0x1e   :  { %p470_p1 = pnand %p469_p0, %p463_p11 }
  0x20   :  { %473 = shalt.err (!%p470_p1)
}
  0x21   :  { %s504_s0 = smov 128   ;;  %s505_s19 = smov 8  }
  0x22   :  { %37 = dma.hbm_to_vmem [thread:$0]  %s719_s2, 2048, %s546_s24, [#allocation7], %s504_s0, %s504_s0, %s505_s19  }
  0x23   :  { %496 = dma.done.wait [#allocation4], 128  }
  0x24   :  { %497 = vsyncadd [#allocation4], 4294967168 }
  0x25   :  { %498 = dma.done.wait [#allocation7], 2048  }
  0x26   :  { %499 = vsyncadd [#allocation7], 4294965248  ;;  %v506_v0 = vmov 0   ;;  %v57_v1 = vld [vmem:[%s720_s3 + $0x10] sm:$0xff]  ;;  %v55_v2 = vld [vmem:[%s720_s3] sm:$0xff]  ;;  %v507_v9 = vmov 0.0|0.0  }
  0x27   :  { %429 = vset.pattern.permute.xlu1 %v506_v0  ;;  %428 = vset.pattern.permute.xlu0 %v506_v0  ;;  %v58_v3 = vld [vmem:[%s720_s3 + $0x18] sm:$0xff]  ;;  %v56_v4 = vld [vmem:[%s720_s3 + $0x8] sm:$0xff]  ;;  %v59_v6 = vld [vmem:[%s720_s3 + $0x20] sm:$0xff]  ;;  %vm508_vm0 = vmmov 0   ;;  %v509_v18 = vmov 0.0   ;;  %s510_s9 = smov [#allocation8]  }
  0x28   :  { %84 = vperm.xlu1 %429, %v57_v1   ;;  %74 = vperm.xlu0 %428, %v55_v2   ;;  %v60_v5 = vld [vmem:[%s720_s3 + $0x28] sm:$0xff]  ;;  %v62_v7 = vld [vmem:[%s720_s3 + $0x38] sm:$0xff]  ;;  %v61_v8 = vld [vmem:[%s720_s3 + $0x30] sm:$0xff]  ;;  %s331_s10 = sshll.u32 %s510_s9, 4  ;;  %s332_s10 = int_to_ptr.vmem [resolvable:$true] %s331_s10 }
  0x29   :  { %395 = vmatprep.subr.bf16.mxu0 %v507_v9  ;;  %v64_v10 = vld [vmem:[%s720_s3 + $0x48] sm:$0xff]  ;;  %v63_v11 = vld [vmem:[%s720_s3 + $0x40] sm:$0xff]  ;;  %v66_v12 = vld [vmem:[%s720_s3 + $0x58] sm:$0xff]  ;;  %392 = vmatprep.mubr.msk.f32.mxu0 %vm508_vm0, %v509_v18  ;;  %p479_p3 = scmp.lt.s32.totalorder %s332_s10, %s332_s10 }
  0x2a   :  { %v65_v13 = vld [vmem:[%s720_s3 + $0x50] sm:$0xff]  ;;  %v68_v14 = vld [vmem:[%s720_s3 + $0x68] sm:$0xff]  ;;  %v67_v15 = vld [vmem:[%s720_s3 + $0x60] sm:$0xff] }
  0x2b   :  { %v70_v16 = vld [vmem:[%s720_s3 + $0x78] sm:$0xff]  ;;  %v69_v17 = vld [vmem:[%s720_s3 + $0x70] sm:$0xff]  ;;  %v629_v19 = vld [vmem:[%s721_s4] ss:$0 sm:$0xff] }
  0x2c   :  { %89 = vperm.xlu1 %429, %v58_v3   ;;  %79 = vperm.xlu0 %428, %v56_v4   ;;  %v190_v24 = vld [vmem:[#allocation6] sm:$0xff]  ;;  %v192_v25 = vld [vmem:[#allocation6 + $0x10] sm:$0xff]  ;;  %v193_v26 = vld [vmem:[#allocation6 + $0x18] sm:$0xff] }
  0x2d   :  { %v191_v28 = vld [vmem:[#allocation6 + $0x8] sm:$0xff]  ;;  %v174_v34 = vld [vmem:[%s718_s1] sm:$0xff]  ;;  %v175_v35 = vld [vmem:[%s718_s1 + $0x8] sm:$0xff] }
  0x2e   :  { %v176_v36 = vld [vmem:[%s718_s1 + $0x10] sm:$0xff]  ;;  %v177_v37 = vld [vmem:[%s718_s1 + $0x18] sm:$0xff]  ;;  %v194_v42 = vld [vmem:[#allocation6 + $0x20] sm:$0xff] }
  0x2f   :  { %v195_v40 = vld [vmem:[#allocation6 + $0x28] sm:$0xff]  ;;  %v179_v50 = vld [vmem:[%s718_s1 + $0x28] sm:$0xff]  ;;  %v178_v54 = vld [vmem:[%s718_s1 + $0x20] sm:$0xff] }
  0x30   :  { %99 = vperm.xlu1 %429, %v60_v5   ;;  %94 = vperm.xlu0 %428, %v59_v6   ;;  %v197_v55 = vld [vmem:[#allocation6 + $0x38] sm:$0xff]  ;;  %v196_v57 = vld [vmem:[#allocation6 + $0x30] sm:$0xff]  ;;  %v180_v2 = vld [vmem:[%s718_s1 + $0x30] sm:$0xff] }
  0x31   :  { %v181_v0 = vld [vmem:[%s718_s1 + $0x38] sm:$0xff]  ;;  %v199_v4 = vld [vmem:[#allocation6 + $0x48] sm:$0xff]  ;;  %v198_v6 = vld [vmem:[#allocation6 + $0x40] sm:$0xff] }
  0x32   :  { %v201_v18 = vld [vmem:[#allocation6 + $0x58] sm:$0xff] }
  0x34   :  { %109 = vperm.xlu1 %429, %v62_v7   ;;  %104 = vperm.xlu0 %428, %v61_v8  }
  0x38   :  { %119 = vperm.xlu1 %429, %v64_v10   ;;  %114 = vperm.xlu0 %428, %v63_v11  }
  0x3c   :  { %129 = vperm.xlu1 %429, %v66_v12   ;;  %124 = vperm.xlu0 %428, %v65_v13   ;;  %v183_v13 = vld [vmem:[%s718_s1 + $0x48] sm:$0xff] }
  0x40   :  { %139 = vperm.xlu1 %429, %v68_v14   ;;  %134 = vperm.xlu0 %428, %v67_v15  }
  0x44   :  { %149 = vperm.xlu1 %429, %v70_v16   ;;  %144 = vperm.xlu0 %428, %v69_v17   ;;  %v182_v17 = vld [vmem:[%s718_s1 + $0x40] sm:$0xff] }
  0xa7   :  { %v85_v20 = vpop.permute.xlu1 %84  ;;  %v75_v21 = vpop.permute.xlu0 %74 }
  0xa8   :  { %v158_v22 = vmul.f32 %v629_v19, %v75_v21  ;;  %v160_v23 = vmul.f32 %v629_v19, %v85_v20  ;;  %v200_v21 = vld [vmem:[#allocation6 + $0x50] sm:$0xff] }
  0xaa   :  { %v206_v30 = vmul.f32 %v190_v24, %v158_v22  ;;  %v208_v33 = vmul.f32 %v192_v25, %v160_v23 }
  0xab   :  { %v90_v27 = vpop.permute.xlu1 %89  ;;  %v80_v29 = vpop.permute.xlu0 %79 }
  0xac   :  { %v161_v31 = vmul.f32 %v629_v19, %v90_v27  ;;  %v159_v32 = vmul.f32 %v629_v19, %v80_v29  ;;  %v222_v46 = vadd.f32 %v206_v30, %v174_v34  ;;  %v224_v48 = vadd.f32 %v208_v33, %v176_v36  ;;  %v184_v30 = vld [vmem:[%s718_s1 + $0x50] sm:$0xff]  ;;  %v202_v34 = vld [vmem:[#allocation6 + $0x60] sm:$0xff] }
  0xae   :  { %v209_v38 = vmul.f32 %v193_v26, %v161_v31  ;;  %v207_v39 = vmul.f32 %v191_v28, %v159_v32  ;;  %v185_v28 = vld [vmem:[%s718_s1 + $0x58] sm:$0xff]  ;;  %v203_v32 = vld [vmem:[#allocation6 + $0x68] sm:$0xff] }
  0xaf   :  { %v100_v41 = vpop.permute.xlu1 %99  ;;  %v95_v43 = vpop.permute.xlu0 %94 }
  0xb0   :  { %v163_v44 = vmul.f32 %v629_v19, %v100_v41  ;;  %v162_v45 = vmul.f32 %v629_v19, %v95_v43  ;;  %v223_v47 = vadd.f32 %v207_v39, %v175_v35  ;;  %v225_v49 = vadd.f32 %v209_v38, %v177_v37 }
  0xb2   :  { %v211_v51 = vmul.f32 %v195_v40, %v163_v44  ;;  %v210_v52 = vmul.f32 %v194_v42, %v162_v45  ;;  %v396_v53 = vpack.c.bf16 %v223_v47, %v222_v46  ;;  %v399_v61 = vpack.c.bf16 %v225_v49, %v224_v48  ;;  %v187_v40 = vld [vmem:[%s718_s1 + $0x68] sm:$0xff]  ;;  %v186_v44 = vld [vmem:[%s718_s1 + $0x60] sm:$0xff]  ;;  %v204_v47 = vld [vmem:[#allocation6 + $0x70] sm:$0xff] }
  0xb3   :  { %v110_v56 = vpop.permute.xlu1 %109  ;;  %v105_v58 = vpop.permute.xlu0 %104  ;;  %v205_v45 = vld [vmem:[#allocation6 + $0x78] sm:$0xff] }
  0xb4   :  { %v165_v59 = vmul.f32 %v629_v19, %v110_v56  ;;  %v164_v60 = vmul.f32 %v629_v19, %v105_v58  ;;  %397 = vmatpush3.bf16.msra.mxu0 %v396_v53  ;;  %v227_v62 = vadd.f32 %v211_v51, %v179_v50  ;;  %v226_v63 = vadd.f32 %v210_v52, %v178_v54  ;;  %v189_v56 = vld [vmem:[%s718_s1 + $0x78] sm:$0xff] }
  0xb5   :  { %398 = vmatprep.subr.bf16.mxu0 %v507_v9 }
  0xb6   :  { %v213_v1 = vmul.f32 %v197_v55, %v165_v59  ;;  %v212_v3 = vmul.f32 %v196_v57, %v164_v60  ;;  %v402_v16 = vpack.c.bf16 %v227_v62, %v226_v63  ;;  %v188_v57 = vld [vmem:[%s718_s1 + $0x70] sm:$0xff]  ;;  %v342_v62 = vld [vmem:[%s722_s5] ss:$0 sm:$0xff]  ;;  %s474_s1 = scalar_lea.vmem %s332_s10, 128 }
  0xb7   :  { %v120_v5 = vpop.permute.xlu1 %119  ;;  %v115_v7 = vpop.permute.xlu0 %114  ;;  %p475_p2 = scmp.ne.s32.totalorder %s332_s10, %s474_s1  ;;  %p480_p4 = scmp.lt.s32.totalorder %s474_s1, %s474_s1 }
  0xb8   :  { %v167_v8 = vmul.f32 %v629_v19, %v120_v5  ;;  %v166_v10 = vmul.f32 %v629_v19, %v115_v7  ;;  %400 = vmatpush3.bf16.msra.mxu0 %v399_v61  ;;  %v229_v11 = vadd.f32 %v213_v1, %v181_v0  ;;  %v228_v12 = vadd.f32 %v212_v3, %v180_v2  ;;  %v239_v61 = vld [vmem:[#allocation3] sm:$0xff] }
  0xb9   :  { %401 = vmatprep.subr.bf16.mxu0 %v507_v9  ;;  %p481_p5 = por %p480_p4, %p479_p3 }
  0xba   :  { %v215_v14 = vmul.f32 %v199_v4, %v167_v8  ;;  %v214_v15 = vmul.f32 %v198_v6, %v166_v10  ;;  %v405_v25 = vpack.c.bf16 %v229_v11, %v228_v12 }
  0xbb   :  { %v130_v20 = vpop.permute.xlu1 %129  ;;  %v125_v22 = vpop.permute.xlu0 %124  ;;  %p482_p6 = pnand %p481_p5, %p475_p2 }
  0xbc   :  { %v169_v23 = vmul.f32 %v629_v19, %v130_v20  ;;  %v168_v24 = vmul.f32 %v629_v19, %v125_v22  ;;  %403 = vmatpush3.bf16.msra.mxu0 %v402_v16  ;;  %v231_v26 = vadd.f32 %v215_v14, %v183_v13  ;;  %v230_v27 = vadd.f32 %v214_v15, %v182_v17 }
  0xbd   :  { %404 = vmatprep.subr.bf16.mxu0 %v507_v9 }
  0xbe   :  { %v217_v29 = vmul.f32 %v201_v18, %v169_v23  ;;  %v216_v31 = vmul.f32 %v200_v21, %v168_v24  ;;  %v408_v43 = vpack.c.bf16 %v231_v26, %v230_v27 }
  0xbf   :  { %v140_v33 = vpop.permute.xlu1 %139  ;;  %v135_v35 = vpop.permute.xlu0 %134 }
  0xc0   :  { %v171_v36 = vmul.f32 %v629_v19, %v140_v33  ;;  %v170_v37 = vmul.f32 %v629_v19, %v135_v35  ;;  %406 = vmatpush3.bf16.msra.mxu0 %v405_v25  ;;  %v233_v38 = vadd.f32 %v217_v29, %v185_v28  ;;  %v232_v39 = vadd.f32 %v216_v31, %v184_v30 }
  0xc1   :  { %407 = vmatprep.subr.bf16.mxu0 %v507_v9 }
  0xc2   :  { %v219_v41 = vmul.f32 %v203_v32, %v171_v36  ;;  %v218_v42 = vmul.f32 %v202_v34, %v170_v37  ;;  %v411_v51 = vpack.c.bf16 %v233_v38, %v232_v39 }
  0xc3   :  { %v150_v46 = vpop.permute.xlu1 %149  ;;  %v145_v48 = vpop.permute.xlu0 %144 }
  0xc4   :  { %v173_v49 = vmul.f32 %v629_v19, %v150_v46  ;;  %v172_v50 = vmul.f32 %v629_v19, %v145_v48  ;;  %409 = vmatpush3.bf16.msra.mxu0 %v408_v43  ;;  %v235_v52 = vadd.f32 %v219_v41, %v187_v40  ;;  %v234_v53 = vadd.f32 %v218_v42, %v186_v44 }
  0xc5   :  { %410 = vmatprep.subr.bf16.mxu0 %v507_v9 }
  0xc6   :  { %v221_v54 = vmul.f32 %v205_v45, %v173_v49  ;;  %v220_v55 = vmul.f32 %v204_v47, %v172_v50  ;;  %v414_v59 = vpack.c.bf16 %v235_v52, %v234_v53 }
  0xc8   :  { %412 = vmatpush3.bf16.msra.mxu0 %v411_v51  ;;  %v237_v19 = vadd.f32 %v221_v54, %v189_v56  ;;  %v236_v58 = vadd.f32 %v220_v55, %v188_v57 }
  0xc9   :  { %413 = vmatprep.subr.bf16.mxu0 %v507_v9 }
  0xca   :  { %v417_v60 = vpack.c.bf16 %v237_v19, %v236_v58 }
  0xcc   :  { %415 = vmatpush3.bf16.msra.mxu0 %v414_v59 }
  0xcd   :  { %416 = vmatprep.subr.bf16.mxu0 %v507_v9 }
  0xd0   :  { %418 = vmatpush3.bf16.msra.mxu0 %v417_v60 }
  0xd3   :  { %393 = vmatmul.mubr.f32.vlgmr.msra.gmra.mrb[0].mxu0 %v239_v61 }
 0x1a6   :  { %v306_v63 = vpop.f32.mrb[0].mxu0 }
 0x1a7   :  { %v323_v0 = vadd.f32 %v342_v62, %v306_v63  ;;  %v394_v1 = vpop.f32.mrb[1].mxu0 }
 0x1a9   :  { %324 = vst [vmem:[#allocation8] sm:$0xff] %v323_v0 }
 0x1aa   :  { %485 = shalt.err (!%p482_p6)
}
 0x1ab   :  { %s486_s13 = scalar_lea.hbm %s723_s6, 128 }
 0x1ac   :  { %p487_p7 = scmp.ne.s32.totalorder %s723_s6, %s486_s13  ;;  %p490_p8 = scmp.lt.u32.totalorder %s486_s13, %s723_s6 }
 0x1ae   :  { %p492_p9 = pnand %p490_p8, %p487_p7 }
 0x1b0   :  { %495 = shalt.err (!%p492_p9)
}
 0x1b1   :  { %334 = dma.vmem_to_hbm [thread:$0]  %s332_s10, 128, %s723_s6, [#allocation5]  }
 0x1b2   :  { %500 = dma.done.wait [#allocation5], 128  }
 0x1b3   :  { %501 = vsyncadd [#allocation5], 4294967168 }
 0x1b4   :  { %338 = vsyncpa [#allocation4], 1 }
 0x1b5   :  { %339 = vsyncpa [#allocation7], 1 }
 0x1b6   :  { %340 = vsyncpa [#allocation5], 1 }

</bundles_post_ra>
